<compile_context>
chip_gen: v7x
topology: tpu7x:2x2x1
jax: 0.10.0
libtpu: 0.0.40
codegen_flags: <defaults>
</compile_context>

<pallas_src>
import math

import jax
import jax.numpy as jnp
from jax import lax
from jax.experimental import pallas as pl
from jax.experimental.pallas import tpu as pltpu


# ---------------------------------------------------------------------------
# Kernel body
# ---------------------------------------------------------------------------
def _make_lookat_kernel(perspective: bool, inv_width: float, scale: float,
                        bB: int, rows_block: int, chunk_rows: int):
    """Build the kernel body; all arguments are static configuration."""
    n_chunks = rows_block // chunk_rows

    def kernel(r_ref, t_ref, v_ref, o_ref):
        # r_ref : SMEM (9*B,)  row-major 3x3 rotation per batch (flattened, no 2-D padding)
        # t_ref : SMEM (3*B,)  translation t = R @ eye per batch (flattened)
        # v_ref : VMEM block (bB, 3, rows_block, 128)  -- (batch, xyz, sublane-rows, lane)
        # o_ref : VMEM block (bB, 3, rows_block, 128)
        bi = pl.program_id(0)

        for lb in range(bB):                       # static unroll over packed batches
            gb = bi * bB + lb                      # global batch index (bB divides B)
            r00 = r_ref[gb * 9 + 0]; r01 = r_ref[gb * 9 + 1]; r02 = r_ref[gb * 9 + 2]
            r10 = r_ref[gb * 9 + 3]; r11 = r_ref[gb * 9 + 4]; r12 = r_ref[gb * 9 + 5]
            r20 = r_ref[gb * 9 + 6]; r21 = r_ref[gb * 9 + 7]; r22 = r_ref[gb * 9 + 8]
            t0 = t_ref[gb * 3 + 0]; t1 = t_ref[gb * 3 + 1]; t2 = t_ref[gb * 3 + 2]

            def do_chunk(row0, rows):
                # Dense (rows, 128) component slabs: full sublane + lane utilization.
                vx = v_ref[lb, 0, pl.ds(row0, rows), :]
                vy = v_ref[lb, 1, pl.ds(row0, rows), :]
                vz = v_ref[lb, 2, pl.ds(row0, rows), :]
                # out_c = R[c,:] . v  -  t_c     (== R[c,:] . (v - eye))
                rx = r00 * vx + r01 * vy + r02 * vz - t0
                ry = r10 * vx + r11 * vy + r12 * vz - t1
                rz = r20 * vx + r21 * vy + r22 * vz - t2
                if perspective:
                    # One exact reciprocal shared by x and y; 1/tan(angle) is a constant.
                    inv = (1.0 / rz) * inv_width
                    o_ref[lb, 0, pl.ds(row0, rows), :] = rx * inv
                    o_ref[lb, 1, pl.ds(row0, rows), :] = ry * inv
                else:
                    o_ref[lb, 0, pl.ds(row0, rows), :] = rx * scale
                    o_ref[lb, 1, pl.ds(row0, rows), :] = ry * scale
                o_ref[lb, 2, pl.ds(row0, rows), :] = rz

            if n_chunks == 1:
                do_chunk(0, rows_block)
            else:
                # Bound vreg/VMEM pressure: work on chunk_rows-row slabs at a time.
                def body(ci, carry):
                    do_chunk(pl.multiple_of(ci * chunk_rows, chunk_rows), chunk_rows)
                    return carry
                lax.fori_loop(0, n_chunks, body, 0, unroll=True)

    return kernel


# ---------------------------------------------------------------------------
# Host-side glue (tiny 3x3 camera math)
# ---------------------------------------------------------------------------
def _normalize(x, eps=1e-5):
    # matches torch.nn.functional.normalize(x, p=2, dim=1, eps=eps)
    n = jnp.linalg.norm(x, axis=1, keepdims=True)
    return x / jnp.maximum(n, eps)


def _camera_matrices(eye, at, up, batch):
    eye = jnp.broadcast_to(jnp.asarray(eye, jnp.float32), (batch, 3))
    at = jnp.broadcast_to(jnp.asarray(at, jnp.float32), (batch, 3))
    up = jnp.broadcast_to(jnp.asarray(up, jnp.float32), (batch, 3))
    z_axis = _normalize(at - eye)
    x_axis = _normalize(jnp.cross(up, z_axis))
    y_axis = _normalize(jnp.cross(z_axis, x_axis))
    r = jnp.stack([x_axis, y_axis, z_axis], axis=1)      # (B, 3, 3), rows = camera axes
    t = jnp.einsum("bij,bj->bi", r, eye)                 # R @ eye
    return r.reshape(batch * 9), t.reshape(batch * 3)     # 1-D: avoids 2-D SMEM padding


def _largest_divisor_leq(n: int, cap: int) -> int:
    cap = max(1, min(n, cap))
    for d in range(cap, 0, -1):
        if n % d == 0:
            return d
    return 1


def _round_up(x: int, m: int) -> int:
    return ((x + m - 1) // m) * m


def _tile_params(B: int, rows_total: int, target_rows: int):
    """Choose (bB, rows_block) so each grid step moves ~target_rows (rows,128) slabs."""
    if rows_total <= target_rows:
        # Small mesh: keep the full mesh in one block and pack several batches per step.
        rows_block = rows_total
        bB = _largest_divisor_leq(B, max(1, target_rows // max(rows_total, 1)))
        if bB == B and B > 1:
            # Keep >=2 grid steps on the (parallel) batch axis so v7x's 2 TCs both run.
            bB = _largest_divisor_leq(B, max(1, B // 2))
    else:
        # Large mesh: tile the vertex axis.
        bB = 1
        rows_block = (target_rows // 8) * 8
        if B == 1:
            # Keep >=2 row-tile steps so both v7x TensorCores get work.
            half8 = _round_up(pl.cdiv(rows_total, 2), 8)
            rows_block = min(rows_block, half8)
        rows_block = max(8, min(rows_block, rows_total))

    # Inner chunk size: bound live (rows,128) slabs when rows_block is large.
    chunk_rows = rows_block
    if rows_block > 64:
        for c in (64, 32, 16, 8):
            if rows_block % c == 0:
                chunk_rows = c
                break
    return bB, rows_block, chunk_rows


def _generation_defaults():
    """Per-generation tile target + VMEM cap (v7x: faster HBM but only 64 MiB VMEM)."""
    kind = ""
    try:
        kind = jax.devices()[0].device_kind.lower()
    except Exception:
        pass
    is_v7 = ("v7" in kind) or ("tpu7" in kind) or ("7x" in kind)
    if is_v7:
        return 4096, (48 << 20)       # ~3.2 TB/s HBM; 64 MiB physical VMEM
    return 1024, (96 << 20)           # v5e/v6e: 0.8-1.4 TB/s HBM; 128 MiB physical VMEM


# ---------------------------------------------------------------------------
# SoA entry point: (B, 3, Nv) in -> (B, 3, Nv) out.  No transposes; HBM is
# touched exactly once each way (reshape to (B,3,R,128) is a free reshape).
# ---------------------------------------------------------------------------
def look_at_transform_soa(vertices_soa,
                          eye,
                          at=(0.0, 0.0, 0.0),
                          up=(0.0, 1.0, 0.0),
                          perspective=True,
                          viewing_angle=30.0,
                          viewing_scale=1.0,
                          target_rows_per_step=None):
    assert vertices_soa.ndim == 3 and vertices_soa.shape[1] == 3
    B, _, Nv = vertices_soa.shape
    v = vertices_soa.astype(jnp.float32)

    target_rows_default, vmem_cap = _generation_defaults()
    target_rows = int(target_rows_per_step or target_rows_default)

    # Pad the vertex axis to a multiple of 128 lanes.  This is a no-op when Nv is already
    # aligned; keep meshes 128-aligned upstream to avoid the extra pad/slice HBM passes.
    Nvp = _round_up(Nv, 128)
    if Nvp != Nv:
        v = jnp.pad(v, ((0, 0), (0, 0), (0, Nvp - Nv)))
    rows_total = Nvp // 128
    v4 = v.reshape(B, 3, rows_total, 128)               # free contiguous reshape

    bB, rows_block, chunk_rows = _tile_params(B, rows_total, target_rows)

    r_flat, t_flat = _camera_matrices(eye, at, up, B)
    inv_width = 1.0 / math.tan(math.radians(viewing_angle))
    kernel = _make_lookat_kernel(perspective, float(inv_width), float(viewing_scale),
                                 bB, rows_block, chunk_rows)

    block = (bB, 3, rows_block, 128)
    grid = (B // bB, pl.cdiv(rows_total, rows_block))

    # Explicit VMEM budget: double-buffered in + out pipeline buffers (4x block) plus
    # headroom for the chunked intermediates / Mosaic scratch; capped per generation.
    block_bytes = bB * 3 * rows_block * 128 * 4
    vmem_limit = min(max(4 * block_bytes + (8 << 20), 24 << 20), vmem_cap)

    out4 = pl.pallas_call(
        kernel,
        out_shape=jax.ShapeDtypeStruct((B, 3, rows_total, 128), jnp.float32),
        grid_spec=pltpu.PrefetchScalarGridSpec(
            num_scalar_prefetch=0,
            grid=grid,
            in_specs=[
                pl.BlockSpec(memory_space=pltpu.MemorySpace.SMEM),   # r_flat (9*B,)
                pl.BlockSpec(memory_space=pltpu.MemorySpace.SMEM),   # t_flat (3*B,)
                pl.BlockSpec(block, lambda bi, ri: (bi, 0, ri, 0)),
            ],
            out_specs=pl.BlockSpec(block, lambda bi, ri: (bi, 0, ri, 0)),
        ),
        compiler_params=pltpu.CompilerParams(
            dimension_semantics=("parallel", "parallel"),
            vmem_limit_bytes=int(vmem_limit)),
    )(r_flat, t_flat, v4)

    out = out4.reshape(B, 3, Nvp)
    if Nvp != Nv:
        out = out[:, :, :Nv]
    return out


# ---------------------------------------------------------------------------
# Module-compatible AoS entry point: (B, Nv, 3) in -> (B, Nv, 3) out.
# The AoS<->SoA transpose happens only at this boundary; pipelines that keep the
# SoA layout should call look_at_transform_soa directly and pay nothing.
# ---------------------------------------------------------------------------
def look_at_transform(vertices,
                      eye,
                      at=(0.0, 0.0, 0.0),
                      up=(0.0, 1.0, 0.0),
                      perspective=True,
                      viewing_angle=30.0,
                      viewing_scale=1.0,
                      target_rows_per_step=None):
    assert vertices.ndim == 3 and vertices.shape[-1] == 3
    v_soa = jnp.transpose(vertices.astype(jnp.float32), (0, 2, 1))
    out_soa = look_at_transform_soa(
        v_soa, eye, at=at, up=up, perspective=perspective,
        viewing_angle=viewing_angle, viewing_scale=viewing_scale,
        target_rows_per_step=target_rows_per_step)
    return jnp.transpose(out_soa, (0, 2, 1))


# ---------------------------------------------------------------------------
# Plain-JAX reference mirroring srf.look_at + srf.perspective/orthogonal.
# ---------------------------------------------------------------------------
def _reference(vertices, eye, at=(0.0, 0.0, 0.0), up=(0.0, 1.0, 0.0),
               perspective=True, viewing_angle=30.0, viewing_scale=1.0):
    B = vertices.shape[0]
    eye = jnp.broadcast_to(jnp.asarray(eye, jnp.float32), (B, 3))
    at = jnp.broadcast_to(jnp.asarray(at, jnp.float32), (B, 3))
    up = jnp.broadcast_to(jnp.asarray(up, jnp.float32), (B, 3))
    z_axis = _normalize(at - eye)
    x_axis = _normalize(jnp.cross(up, z_axis))
    y_axis = _normalize(jnp.cross(z_axis, x_axis))
    r = jnp.stack([x_axis, y_axis, z_axis], axis=1)          # (B, 3, 3)
    v = vertices - eye[:, None, :]
    v = jnp.einsum("bnk,bck->bnc", v, r)                     # v @ R^T
    z = v[:, :, 2]
    if perspective:
        width = math.tan(math.radians(viewing_angle))
        x = v[:, :, 0] / z / width
        y = v[:, :, 1] / z / width
    else:
        x = v[:, :, 0] * viewing_scale
        y = v[:, :, 1] * viewing_scale
    return jnp.stack([x, y, z], axis=2)


if __name__ == "__main__":
    key = jax.random.PRNGKey(0)
    k1, k2, k3 = jax.random.split(key, 3)

    # Default eye from LookAt.__init__ (perspective=True, viewing_angle=30)
    viewing_angle = 30.0
    eye = [0.0, 0.0, -(1.0 / math.tan(math.radians(viewing_angle)) + 1.0)]

    # Case 1: perspective branch, lane-aligned vertex count (AoS module-compatible path).
    B, Nv = 2, 256
    vertices = jax.random.normal(k1, (B, Nv, 3), dtype=jnp.float32) * 0.3
    out = look_at_transform(vertices, eye, perspective=True,
                            viewing_angle=viewing_angle)
    out = jax.block_until_ready(out)
    ref = _reference(vertices, eye, perspective=True, viewing_angle=viewing_angle)
    assert out.shape == (B, Nv, 3), out.shape
    assert jnp.allclose(out, ref, atol=1e-5, rtol=1e-5), \
        float(jnp.max(jnp.abs(out - ref)))

    # Case 2: orthogonal branch, non-multiple-of-128 vertex count (exercises padding).
    Nv2 = 200
    verts2 = jax.random.normal(k2, (B, Nv2, 3), dtype=jnp.float32) * 0.3
    out2 = look_at_transform(verts2, eye, perspective=False, viewing_scale=2.0)
    out2 = jax.block_until_ready(out2)
    ref2 = _reference(verts2, eye, perspective=False, viewing_scale=2.0)
    assert out2.shape == (B, Nv2, 3), out2.shape
    assert jnp.allclose(out2, ref2, atol=1e-5, rtol=1e-5), \
        float(jnp.max(jnp.abs(out2 - ref2)))

    # Case 3: small-mesh / larger-batch regime via the native SoA path
    # (exercises batch packing: several meshes per grid step, no wrapper transposes).
    B3, Nv3 = 8, 642
    verts3_aos = jax.random.normal(k3, (B3, Nv3, 3), dtype=jnp.float32) * 0.3
    verts3_soa = jnp.transpose(verts3_aos, (0, 2, 1))
    out3_soa = look_at_transform_soa(verts3_soa, eye, perspective=True,
                                     viewing_angle=viewing_angle)
    out3_soa = jax.block_until_ready(out3_soa)
    ref3 = _reference(verts3_aos, eye, perspective=True, viewing_angle=viewing_angle)
    out3 = jnp.transpose(out3_soa, (0, 2, 1))
    assert out3.shape == (B3, Nv3, 3), out3.shape
    assert jnp.allclose(out3, ref3, atol=1e-5, rtol=1e-5), \
        float(jnp.max(jnp.abs(out3 - ref3)))

    print("KERNEL_OK")
</pallas_src>

<mosaic_0001>
module attributes {stable_mosaic.version = 11 : i64} {
  func.func @kernel(%arg0: i32, %arg1: i32, %arg2: memref<18xf32, #tpu.memory_space<smem>>, %arg3: memref<6xf32, #tpu.memory_space<smem>>, %arg4: memref<1x3x2x128xf32, #tpu.memory_space<vmem>>, %arg5: memref<1x3x2x128xf32, #tpu.memory_space<vmem>>) attributes {dimension_semantics = [#tpu.dimension_semantics<parallel>, #tpu.dimension_semantics<parallel>], iteration_bounds = array<i64: 2, 1>, scalar_prefetch = 0 : i64, scratch_operands = 0 : i64, tpu.core_type = #tpu.core_type<tc>, window_params = [{transform_indices = @transform_0, window_bounds = array<i64: 18>}, {transform_indices = @transform_1, window_bounds = array<i64: 6>}, {transform_indices = @transform_2, window_bounds = array<i64: 1, 3, 2, 128>}, {transform_indices = @transform_3, window_bounds = array<i64: 1, 3, 2, 128>}]} {
    %c1_i32 = arith.constant 1 : i32
    %0 = arith.muli %arg0, %c1_i32 : i32
    %c0_i32 = arith.constant 0 : i32
    %1 = arith.addi %0, %c0_i32 : i32
    %c9_i32 = arith.constant 9 : i32
    %2 = arith.muli %1, %c9_i32 : i32
    %c0_i32_0 = arith.constant 0 : i32
    %3 = arith.addi %2, %c0_i32_0 : i32
    %4 = arith.index_cast %3 : i32 to index
    %5 = memref.load %arg2[%4] : memref<18xf32, #tpu.memory_space<smem>>
    %c9_i32_1 = arith.constant 9 : i32
    %6 = arith.muli %1, %c9_i32_1 : i32
    %c1_i32_2 = arith.constant 1 : i32
    %7 = arith.addi %6, %c1_i32_2 : i32
    %8 = arith.index_cast %7 : i32 to index
    %9 = memref.load %arg2[%8] : memref<18xf32, #tpu.memory_space<smem>>
    %c9_i32_3 = arith.constant 9 : i32
    %10 = arith.muli %1, %c9_i32_3 : i32
    %c2_i32 = arith.constant 2 : i32
    %11 = arith.addi %10, %c2_i32 : i32
    %12 = arith.index_cast %11 : i32 to index
    %13 = memref.load %arg2[%12] : memref<18xf32, #tpu.memory_space<smem>>
    %c9_i32_4 = arith.constant 9 : i32
    %14 = arith.muli %1, %c9_i32_4 : i32
    %c3_i32 = arith.constant 3 : i32
    %15 = arith.addi %14, %c3_i32 : i32
    %16 = arith.index_cast %15 : i32 to index
    %17 = memref.load %arg2[%16] : memref<18xf32, #tpu.memory_space<smem>>
    %c9_i32_5 = arith.constant 9 : i32
    %18 = arith.muli %1, %c9_i32_5 : i32
    %c4_i32 = arith.constant 4 : i32
    %19 = arith.addi %18, %c4_i32 : i32
    %20 = arith.index_cast %19 : i32 to index
    %21 = memref.load %arg2[%20] : memref<18xf32, #tpu.memory_space<smem>>
    %c9_i32_6 = arith.constant 9 : i32
    %22 = arith.muli %1, %c9_i32_6 : i32
    %c5_i32 = arith.constant 5 : i32
    %23 = arith.addi %22, %c5_i32 : i32
    %24 = arith.index_cast %23 : i32 to index
    %25 = memref.load %arg2[%24] : memref<18xf32, #tpu.memory_space<smem>>
    %c9_i32_7 = arith.constant 9 : i32
    %26 = arith.muli %1, %c9_i32_7 : i32
    %c6_i32 = arith.constant 6 : i32
    %27 = arith.addi %26, %c6_i32 : i32
    %28 = arith.index_cast %27 : i32 to index
    %29 = memref.load %arg2[%28] : memref<18xf32, #tpu.memory_space<smem>>
    %c9_i32_8 = arith.constant 9 : i32
    %30 = arith.muli %1, %c9_i32_8 : i32
    %c7_i32 = arith.constant 7 : i32
    %31 = arith.addi %30, %c7_i32 : i32
    %32 = arith.index_cast %31 : i32 to index
    %33 = memref.load %arg2[%32] : memref<18xf32, #tpu.memory_space<smem>>
    %c9_i32_9 = arith.constant 9 : i32
    %34 = arith.muli %1, %c9_i32_9 : i32
    %c8_i32 = arith.constant 8 : i32
    %35 = arith.addi %34, %c8_i32 : i32
    %36 = arith.index_cast %35 : i32 to index
    %37 = memref.load %arg2[%36] : memref<18xf32, #tpu.memory_space<smem>>
    %c3_i32_10 = arith.constant 3 : i32
    %38 = arith.muli %1, %c3_i32_10 : i32
    %c0_i32_11 = arith.constant 0 : i32
    %39 = arith.addi %38, %c0_i32_11 : i32
    %40 = arith.index_cast %39 : i32 to index
    %41 = memref.load %arg3[%40] : memref<6xf32, #tpu.memory_space<smem>>
    %c3_i32_12 = arith.constant 3 : i32
    %42 = arith.muli %1, %c3_i32_12 : i32
    %c1_i32_13 = arith.constant 1 : i32
    %43 = arith.addi %42, %c1_i32_13 : i32
    %44 = arith.index_cast %43 : i32 to index
    %45 = memref.load %arg3[%44] : memref<6xf32, #tpu.memory_space<smem>>
    %c3_i32_14 = arith.constant 3 : i32
    %46 = arith.muli %1, %c3_i32_14 : i32
    %c2_i32_15 = arith.constant 2 : i32
    %47 = arith.addi %46, %c2_i32_15 : i32
    %48 = arith.index_cast %47 : i32 to index
    %49 = memref.load %arg3[%48] : memref<6xf32, #tpu.memory_space<smem>>
    %c0 = arith.constant 0 : index
    %c0_16 = arith.constant 0 : index
    %c0_17 = arith.constant 0 : index
    %c0_18 = arith.constant 0 : index
    %50 = vector.load %arg4[%c0, %c0_16, %c0_17, %c0_18] : memref<1x3x2x128xf32, #tpu.memory_space<vmem>>, vector<1x1x2x128xf32>
    %51 = vector.shape_cast %50 : vector<1x1x2x128xf32> to vector<2x128xf32>
    %c0_19 = arith.constant 0 : index
    %c1 = arith.constant 1 : index
    %c0_20 = arith.constant 0 : index
    %c0_21 = arith.constant 0 : index
    %52 = vector.load %arg4[%c0_19, %c1, %c0_20, %c0_21] : memref<1x3x2x128xf32, #tpu.memory_space<vmem>>, vector<1x1x2x128xf32>
    %53 = vector.shape_cast %52 : vector<1x1x2x128xf32> to vector<2x128xf32>
    %c0_22 = arith.constant 0 : index
    %c2 = arith.constant 2 : index
    %c0_23 = arith.constant 0 : index
    %c0_24 = arith.constant 0 : index
    %54 = vector.load %arg4[%c0_22, %c2, %c0_23, %c0_24] : memref<1x3x2x128xf32, #tpu.memory_space<vmem>>, vector<1x1x2x128xf32>
    %55 = vector.shape_cast %54 : vector<1x1x2x128xf32> to vector<2x128xf32>
    %56 = vector.broadcast %5 : f32 to vector<2x128xf32>
    %57 = arith.mulf %56, %51 : vector<2x128xf32>
    %58 = vector.broadcast %9 : f32 to vector<2x128xf32>
    %59 = arith.mulf %58, %53 : vector<2x128xf32>
    %60 = arith.addf %57, %59 : vector<2x128xf32>
    %61 = vector.broadcast %13 : f32 to vector<2x128xf32>
    %62 = arith.mulf %61, %55 : vector<2x128xf32>
    %63 = arith.addf %60, %62 : vector<2x128xf32>
    %64 = vector.broadcast %41 : f32 to vector<2x128xf32>
    %65 = arith.subf %63, %64 : vector<2x128xf32>
    %66 = vector.broadcast %17 : f32 to vector<2x128xf32>
    %67 = arith.mulf %66, %51 : vector<2x128xf32>
    %68 = vector.broadcast %21 : f32 to vector<2x128xf32>
    %69 = arith.mulf %68, %53 : vector<2x128xf32>
    %70 = arith.addf %67, %69 : vector<2x128xf32>
    %71 = vector.broadcast %25 : f32 to vector<2x128xf32>
    %72 = arith.mulf %71, %55 : vector<2x128xf32>
    %73 = arith.addf %70, %72 : vector<2x128xf32>
    %74 = vector.broadcast %45 : f32 to vector<2x128xf32>
    %75 = arith.subf %73, %74 : vector<2x128xf32>
    %76 = vector.broadcast %29 : f32 to vector<2x128xf32>
    %77 = arith.mulf %76, %51 : vector<2x128xf32>
    %78 = vector.broadcast %33 : f32 to vector<2x128xf32>
    %79 = arith.mulf %78, %53 : vector<2x128xf32>
    %80 = arith.addf %77, %79 : vector<2x128xf32>
    %81 = vector.broadcast %37 : f32 to vector<2x128xf32>
    %82 = arith.mulf %81, %55 : vector<2x128xf32>
    %83 = arith.addf %80, %82 : vector<2x128xf32>
    %84 = vector.broadcast %49 : f32 to vector<2x128xf32>
    %85 = arith.subf %83, %84 : vector<2x128xf32>
    %cst = arith.constant 1.000000e+00 : f32
    %86 = vector.broadcast %cst : f32 to vector<2x128xf32>
    %87 = arith.divf %86, %85 : vector<2x128xf32>
    %cst_25 = arith.constant 1.73205078 : f32
    %88 = vector.broadcast %cst_25 : f32 to vector<2x128xf32>
    %89 = arith.mulf %87, %88 : vector<2x128xf32>
    %90 = arith.mulf %65, %89 : vector<2x128xf32>
    %c0_26 = arith.constant 0 : index
    %c0_27 = arith.constant 0 : index
    %c0_28 = arith.constant 0 : index
    %c0_29 = arith.constant 0 : index
    %91 = vector.load %arg5[%c0_26, %c0_27, %c0_28, %c0_29] : memref<1x3x2x128xf32, #tpu.memory_space<vmem>>, vector<1x1x2x128xf32>
    %92 = vector.shape_cast %91 : vector<1x1x2x128xf32> to vector<2x128xf32>
    %93 = vector.shape_cast %90 : vector<2x128xf32> to vector<1x1x2x128xf32>
    tpu.vector_store %arg5[%c0_26, %c0_27, %c0_28, %c0_29], %93 {strides = array<i32>} : memref<1x3x2x128xf32, #tpu.memory_space<vmem>>, vector<1x1x2x128xf32>,
    %94 = arith.mulf %75, %89 : vector<2x128xf32>
    %c0_30 = arith.constant 0 : index
    %c1_31 = arith.constant 1 : index
    %c0_32 = arith.constant 0 : index
    %c0_33 = arith.constant 0 : index
    %95 = vector.load %arg5[%c0_30, %c1_31, %c0_32, %c0_33] : memref<1x3x2x128xf32, #tpu.memory_space<vmem>>, vector<1x1x2x128xf32>
    %96 = vector.shape_cast %95 : vector<1x1x2x128xf32> to vector<2x128xf32>
    %97 = vector.shape_cast %94 : vector<2x128xf32> to vector<1x1x2x128xf32>
    tpu.vector_store %arg5[%c0_30, %c1_31, %c0_32, %c0_33], %97 {strides = array<i32>} : memref<1x3x2x128xf32, #tpu.memory_space<vmem>>, vector<1x1x2x128xf32>,
    %c0_34 = arith.constant 0 : index
    %c2_35 = arith.constant 2 : index
    %c0_36 = arith.constant 0 : index
    %c0_37 = arith.constant 0 : index
    %98 = vector.load %arg5[%c0_34, %c2_35, %c0_36, %c0_37] : memref<1x3x2x128xf32, #tpu.memory_space<vmem>>, vector<1x1x2x128xf32>
    %99 = vector.shape_cast %98 : vector<1x1x2x128xf32> to vector<2x128xf32>
    %100 = vector.shape_cast %85 : vector<2x128xf32> to vector<1x1x2x128xf32>
    tpu.vector_store %arg5[%c0_34, %c2_35, %c0_36, %c0_37], %100 {strides = array<i32>} : memref<1x3x2x128xf32, #tpu.memory_space<vmem>>, vector<1x1x2x128xf32>,
    return
  }
  func.func @transform_0(%arg0: i32, %arg1: i32) -> i32 {
    %c0_i32 = arith.constant 0 : i32
    %c0_i32_0 = arith.constant 0 : i32
    return %c0_i32 : i32
  }
  func.func @transform_1(%arg0: i32, %arg1: i32) -> i32 {
    %c0_i32 = arith.constant 0 : i32
    %c0_i32_0 = arith.constant 0 : i32
    return %c0_i32 : i32
  }
  func.func @transform_2(%arg0: i32, %arg1: i32) -> (i32, i32, i32, i32) {
    %c0_i32 = arith.constant 0 : i32
    %c0_i32_0 = arith.constant 0 : i32
    %c0_i32_1 = arith.constant 0 : i32
    return %arg0, %c0_i32, %arg1, %c0_i32_0 : i32, i32, i32, i32
  }
  func.func @transform_3(%arg0: i32, %arg1: i32) -> (i32, i32, i32, i32) {
    %c0_i32 = arith.constant 0 : i32
    %c0_i32_0 = arith.constant 0 : i32
    %c0_i32_1 = arith.constant 0 : i32
    return %arg0, %c0_i32, %arg1, %c0_i32_0 : i32, i32, i32, i32
  }
}

</mosaic_0001>

<bundles_post_ra>
// kernel: tpu_custom_call.1
= control target key start
LH: loop header
LB: loop body
LE: loop exit
PB: predicated region body
PF: predicated region fallthrough
CT: control target
= control target key end

     0   :  { %s954_s0 = inlined_call_operand.hbm [shape: f32[18], index: 0, kind: input, shape index: {}]   ;;  %s955_s1 = inlined_call_operand.vmem [shape: f32[6], index: 1, kind: input, shape index: {}]   ;;  %s956_s2 = inlined_call_operand.hbm [shape: f32[2,3,2,128], index: 2, kind: input, shape index: {}]   ;;  %s957_s3 = inlined_call_operand.hbm [shape: f32[2,3,2,128], index: 3, kind: output, shape index: {}]  }
   0x1   :  { %963 = sst [smem:[#allocation14_spill]] %s954_s0 }
   0x2   :  { %964 = sst [smem:[#allocation15_spill]] %s955_s1 }
   0x3   :  { %965 = sst [smem:[#allocation16_spill]] %s956_s2 }
   0x4   :  { %8 = vsyncpa [#allocation5], 0 }
   0x5   :  { %9 = vsyncpa [#allocation6], 0 }
   0x6   :  { %10 = vsyncpa [#allocation3], 0 }
   0x7   :  { %12 = vsyncpa [#allocation3 + $0x1], 0 }
   0x8   :  { %13 = vsyncpa [#allocation4], 0 }
   0x9   :  { %15 = vsyncpa [#allocation4 + $0x1], 0  ;;  %s712_s12 = smov 0   ;;  %s714_s13 = smov 0  }
   0xa   :  { %s716_s14 = smov 0   ;;  %s718_s15 = smov 0  }
   0xb   :  { %s720_s16 = smov 0   ;;  %s722_s17 = smov 0  }
   0xc LB: > { %s424_s18 = sadd.s32 4294967295, %s682_s17   ;;  %s425_s19 = sadd.s32 4294967294, %s682_s17   ;;  %s682_s17 = sphi %s722_s17, %s21_s17   ;;  %s678_s16 = sphi %s720_s16, %s986_s16   ;;  %s674_s15 = sphi %s718_s15, %s985_s15   ;;  %s670_s14 = sphi %s716_s14, %s984_s14   ;;  %s666_s13 = sphi %s714_s13, %s983_s13   ;;  %s662_s12 = sphi %s712_s12, %s982_s12  }
   0xd   : > { %s84_s20 = sadd.s32 1, %s670_s14  ;;  %p91_p0 = scmp.ne.s32.totalorder %s670_s14, %s666_s13 }
   0xe   : > { %p92_p1 = scmp.eq.s32.totalorder %s682_s17, 0  ;;  %p97_p2 = scmp.ne.s32.totalorder %s666_s13, %s662_s12 }
   0xf   : > { %p750_p3 = scmp.eq.s32.totalorder %s424_s18, 0  ;;  %p123_p4 = scmp.eq.s32.totalorder %s424_s18, 1 }
  0x10   : > { %p93_p5 = por %p92_p1, %p91_p0  ;;  %p129_p6 = scmp.eq.s32.totalorder %s425_s19, 1 }
  0x11   : > { %s966_s21 = scalar_select %p750_p3, 1, 0 }
  0x12   : > { %p756_p7 = por %p750_p3, %p97_p2  ;;  %p760_p8 = por %p123_p4, %p91_p0 }
  0x13   : > { %p764_p9 = por %p129_p6, %p97_p2  ;;  %p426_p10 = scmp.ge.s32.totalorder %s682_s17, 1 }
  0x14   : > { %s967_s22 = scalar_select %p756_p7, 1, 0 }
  0x15   : > { %s968_s23 = scalar_select %p760_p8, 1, 0 }
  0x16   : > { %s969_s24 = scalar_select %p764_p9, 1, 0 }
  0x17   : > { %p136_p11 = scmp.lt.s32.totalorder %s682_s17, 3  ;;  %p474_p1 = scmp.lt.s32.totalorder %s682_s17, 2 }
  0x18   : > { %s971_s1 = sld [smem:[#allocation15_spill]]  ;;  %s169_s4 = sand.u32 1, %s670_s14  }
  0x19   : > { %p771_p13 = pnand %p426_p10, %p136_p11  ;;  %p781_p4 = pnand %p474_p1, %p93_p5 }
  0x1a   : > { %s33_s5 = sadd.s32 1, %s678_s16  ;;  %s974_s0 = sld [smem:[#allocation14_spill]] }
  0x1b   : > { %p457_p0 = pneg %p771_p13 }
  0x1d   : > { %p787_p2 = pnand %p457_p0, %p750_p3 }
  0x1e   : > { %s158_s28 = sshll.u32 %s971_s1, 4  ;;  %s159_s28 = int_to_ptr.vmem [resolvable:$true] %s158_s28 }
  0x1f   : > { %p536_p6 = pneg %p787_p2 }
  0x20   : > { %s534_s8 = scalar_lea.hbm %s974_s0, 16 }
  0x21   : > { %p535_p5 = scmp.ne.s32.totalorder %s974_s0, %s534_s8  ;;  %p541_p1 = scmp.lt.u32.totalorder %s534_s8, %s974_s0 }
  0x23   : > { %p537_p10 = pnand %p536_p6, %p535_p5 }
  0x25   : > { %p538_p11 = pneg %p537_p10 }
  0x27   : > { %p543_p0 = pnand %p541_p1, %p538_p11 }
  0x29   : > { %546 = shalt.err (!%p543_p0)
}
  0x2a   : > { %s684_s19 = smov [#allocation2]   ;;  %s547_s6 = scalar_lea.vmem %s159_s28, 16 }
  0x2b   : > { %460 = dma.hbm_to_smem (!%p787_p2), %s974_s0, 16, %s684_s19, [#allocation5]  }
  0x2c   : > { %p548_p12 = scmp.ne.s32.totalorder %s159_s28, %s547_s6  ;;  %p555_p7 = scmp.lt.s32.totalorder %s159_s28, %s159_s28 }
  0x2d   : > { %p556_p5 = scmp.lt.s32.totalorder %s547_s6, %s547_s6 }
  0x2e   : > { %p550_p9 = pnand %p548_p12, %p536_p6 }
  0x2f   : > { %p557_p10 = por %p556_p5, %p555_p7 }
  0x30   : > { %p551_p8 = pneg %p550_p9 }
  0x32   : > { %p558_p3 = pnand %p557_p10, %p551_p8 }
  0x34   : > { %561 = shalt.err (!%p558_p3)
}
  0x35   : > { %s685_s7 = smov [#allocation7]   ;;  %p35_p11 = scmp.ge.s32.totalorder %s33_s5, 2 }
  0x36   : > { %463 = dma.vmem_to_smem (!%p787_p2), %s159_s28, 16, %s685_s7, [#allocation6]  }
  0x37   : > { %s441_s8 = smul.u32 6, %s169_s4  ;;  %s988_s5 = smov (%p35_p11, %s33_s5), 0 }
  0x38   : > { %s442_s9 = smul.u32 96, %s678_s16  ;;  %s79_s10 = ssub.s32 %s678_s16, %s988_s5 }
  0x39   : > { %s173_s11 = scalar_lea.vmem [#allocation8], %s441_s8  ;;  %p82_p3 = scmp.eq.s32.totalorder %s79_s10, 0 }
  0x3a   : > { %s181_s18 = sshll.u32 %s173_s11, 4  ;;  %s975_s2 = sld [smem:[#allocation16_spill]]  ;;  %s823_s18 = int_to_ptr.vmem [resolvable:$true] %s181_s18 }
  0x3b   : > { %s828_s28 = scalar_select %p82_p3, %s670_s14, %s84_s20  }
  0x3c   : > { %s832_s27 = scalar_lea.sflag [#allocation3], %s169_s4  ;;  %p564_p8 = pneg %p781_p4 }
  0x40   : > { %s821_s26 = scalar_lea.hbm %s975_s2, %s442_s9  ;;  %s567_s9 = scalar_lea.hbm %s975_s2, 192 }
  0x41   : > { %s562_s6 = scalar_lea.hbm %s821_s26, 96  ;;  %p568_p2 = scmp.lt.u32.totalorder %s821_s26, %s975_s2 }
  0x42   : > { %p563_p7 = scmp.ne.s32.totalorder %s821_s26, %s562_s6  ;;  %p569_p6 = scmp.lt.u32.totalorder %s567_s9, %s562_s6 }
  0x43   : > { %p571_p0 = scmp.lt.u32.totalorder %s562_s6, %s821_s26 }
  0x44   : > { %p565_p9 = pnand %p564_p8, %p563_p7  ;;  %p570_p1 = por %p569_p6, %p568_p2 }
  0x46   : > { %p566_p12 = pneg %p565_p9  ;;  %p572_p5 = por %p571_p0, %p570_p1 }
  0x48   : > { %p573_p10 = pnand %p572_p5, %p566_p12 }
  0x4a   : > { %576 = shalt.err (!%p573_p10)
}
  0x4b   : > { %s577_s20 = scalar_lea.vmem %s823_s18, 96  ;;  %s686_s4 = smov [#allocation8]  }
  0x4c   : > { %p578_p11 = scmp.ne.s32.totalorder %s823_s18, %s577_s20  ;;  %s582_s30 = sshll.u32 %s686_s4, 4  ;;  %s583_s30 = int_to_ptr.vmem [resolvable:$false] %s582_s30 }
  0x4d   : > { %s584_s19 = scalar_lea.vmem %s583_s30, 192  ;;  %p585_p9 = scmp.lt.s32.totalorder %s823_s18, %s583_s30 }
  0x4e   : > { %p580_p3 = pnand %p578_p11, %p564_p8  ;;  %p586_p2 = scmp.lt.s32.totalorder %s584_s19, %s577_s20 }
  0x50   : > { %p581_p7 = pneg %p580_p3  ;;  %p587_p6 = por %p586_p2, %p585_p9 }
  0x52   : > { %p588_p1 = pnand %p587_p6, %p581_p7 }
  0x54   : > { %591 = shalt.err (!%p588_p1)
}
  0x55   : > { %s687_s6 = smov 32   ;;  %s688_s7 = smov 2  }
  0x56   : > { %467 = dma.hbm_to_vmem [thread:$0]  (!%p781_p4), %s821_s26, 96, %s823_s18, %s832_s27, %s687_s6, %s687_s6, %s688_s7  }
  0x57   : > { %193 = sbr.rel (%p771_p13) target bundleno = 154 (0x9a), region = 32  ;;  %p976_p8 = scmp.ne.s32.totalorder (!%p771_p13), %s966_s21, 0 }
  0x5e   : > { %645 = dma.done.wait (%p976_p8), [#allocation5], 16  }
  0x5f   : > { %647 = vsyncadd (%p976_p8), [#allocation5], 4294967280 }
  0x60   : > { %649 = dma.done.wait (%p976_p8), [#allocation6], 16  }
  0x61   : > { %651 = vsyncadd (%p976_p8), [#allocation6], 4294967280  ;;  %s871_s8 = sand.u32 1, %s666_s13   ;;  %p977_p13 = scmp.ne.s32.totalorder %s967_s22, 0 }
  0x62   : > { %s962_s25 = smul.u32 6, %s871_s8  ;;  %s204_s29 = scalar_lea.sflag [#allocation3], %s871_s8 }
  0x64   : > { %s207_s18 = scalar_lea.vmem [#allocation8], %s962_s25 }
  0x65   : > { %653 = dma.done.wait (%p977_p13), %s204_s29, 96  }
  0x66   : > { %655 = vsyncadd (%p977_p13), %s204_s29, 4294967200 }
  0x67   : > { %212 = sfence }
  0x68   : > { %s231_s21 = smul.u32 9, %s674_s15  ;;  %v255_v0 = vld [vmem:[%s207_s18] sm:$0x3]  ;;  %v434_v1 = vld [vmem:[%s207_s18 + $0x2] sm:$0x3]  ;;  %p979_p12 = scmp.ne.s32.totalorder %s968_s23, 0 }
  0x69   : > { %s883_s26 = smul.u32 3, %s674_s15  ;;  %v435_v2 = vld [vmem:[%s207_s18 + $0x4] sm:$0x3] }
  0x6a   : > { %s885_s27 = sld [smem:[#allocation2 + %s231_s21]]  ;;  %s233_s9 = sadd.s32 1, %s231_s21 }
  0x6b   : > { %s235_s10 = sadd.s32 2, %s231_s21  ;;  %s243_s11 = sadd.s32 6, %s231_s21 }
  0x6c   : > { %s244_s20 = sld [smem:[#allocation2 + %s243_s11]]  ;;  %s245_s4 = sadd.s32 7, %s231_s21 }
  0x6d   : > { %s246_s30 = sld [smem:[#allocation2 + %s245_s4]]  ;;  %s247_s19 = sadd.s32 8, %s231_s21 }
  0x6e   : > { %s234_s6 = sld [smem:[#allocation2 + %s233_s9]]  ;;  %s253_s29 = sadd.s32 2, %s883_s26 }
  0x6f   : > { %s248_s7 = sld [smem:[#allocation2 + %s247_s19]]  ;;  %s237_s0 = sadd.s32 3, %s231_s21 }
  0x70   : > { %s887_s22 = sld [smem:[#allocation2 + %s235_s10]]  ;;  %s239_s2 = sadd.s32 4, %s231_s21  ;;  %v260_v9 = vstv %s885_s27 }
  0x71   : > { %s890_s25 = sld [smem:[#allocation7 + %s253_s29]]  ;;  %s241_s4 = sadd.s32 5, %s231_s21  ;;  %v261_v16 = vmul.f32 %v260_v9, %v255_v0 }
  0x72   : > { %s238_s1 = sld [smem:[#allocation2 + %s237_s0]]  ;;  %v280_v3 = vstv %s244_s20  ;;  %s251_s0 = sadd.s32 1, %s883_s26 }
  0x73   : > { %s240_s11 = sld [smem:[#allocation2 + %s239_s2]]  ;;  %v281_v4 = vmul.f32 %v280_v3, %v255_v0  ;;  %v282_v5 = vstv %s246_s30  ;;  %s978_s21 = smul.u32 6, %s871_s8 }
  0x74   : > { %s242_s9 = sld [smem:[#allocation2 + %s241_s4]]  ;;  %v283_v6 = vmul.f32 %v434_v1, %v282_v5  ;;  %v262_v10 = vstv %s234_s6  ;;  %s301_s30 = scalar_lea.sflag [#allocation4], %s871_s8 }
  0x75   : > { %v285_v7 = vstv %s248_s7  ;;  %v263_v17 = vmul.f32 %v434_v1, %v262_v10  ;;  %s250_s2 = sld [smem:[#allocation7 + %s883_s26]]  ;;  %s230_s27 = scalar_lea.vmem [#allocation9], %s978_s21 }
  0x76   : > { %v286_v8 = vmul.f32 %v435_v2, %v285_v7  ;;  %v284_v11 = vadd.f32 %v283_v6, %v281_v4  ;;  %v265_v20 = vstv %s887_s22  ;;  %s252_s18 = sld [smem:[#allocation7 + %s251_s0]] }
  0x77   : > { %v288_v12 = vstv %s890_s25  ;;  %v264_v23 = vadd.f32 %v263_v17, %v261_v16  ;;  %v266_v24 = vmul.f32 %v435_v2, %v265_v20  ;;  %s444_s25 = smul.u32 96, %s674_s15  ;;  %s689_s15 = smov [#allocation9]  }
  0x78   : > { %v270_v13 = vstv %s238_s1  ;;  %v287_v14 = vadd.f32 %v286_v8, %v284_v11  ;;  %s315_s1 = sshll.u32 %s230_s27, 4  ;;  %s596_s6 = sshll.u32 %s689_s15, 4  ;;  %s900_s1 = int_to_ptr.vmem [resolvable:$true] %s315_s1  ;;  %s597_s6 = int_to_ptr.vmem [resolvable:$false] %s596_s6 }
  0x79   : > { %v272_v15 = vstv %s240_s11  ;;  %v271_v18 = vmul.f32 %v270_v13, %v255_v0  ;;  %v267_v27 = vadd.f32 %v266_v24, %v264_v23  ;;  %s905_s20 = scalar_lea.hbm %s957_s3, %s444_s25  ;;  %s592_s19 = scalar_lea.vmem %s900_s1, 96 }
  0x7a   : > { %v273_v19 = vmul.f32 %v434_v1, %v272_v15  ;;  %v289_v21 = vsub.f32 %v287_v14, %v288_v12  ;;  %v275_v22 = vstv %s242_s9  ;;  %p593_p4 = scmp.ne.s32.totalorder %s900_s1, %s592_s19  ;;  %s598_s7 = scalar_lea.vmem %s597_s6, 192 }
  0x7b   : > { %v276_v26 = vmul.f32 %v435_v2, %v275_v22  ;;  %v268_v29 = vstv %s250_s2  ;;  %p599_p10 = scmp.lt.s32.totalorder %s900_s1, %s597_s6  ;;  %p600_p11 = scmp.lt.s32.totalorder %s598_s7, %s592_s19 }
  0x7c   : > { %532 = vrcp.f32 %v289_v21  ;;  %437 = vst [vmem:[%s230_s27 + $0x4] sm:$0x3] %v289_v21  ;;  %v274_v25 = vadd.f32 %v273_v19, %v271_v18  ;;  %v278_v30 = vstv %s252_s18  ;;  %v269_v31 = vsub.f32 %v267_v27, %v268_v29  ;;  %p594_p0 = pnand %p593_p4, %p979_p12 }
  0x7d   : > { %p601_p3 = por %p600_p11, %p599_p10 }
  0x7e   : > { %v277_v28 = vadd.f32 %v276_v26, %v274_v25  ;;  %p595_p5 = pneg %p594_p0 }
  0x80   : > { %v279_v32 = vsub.f32 %v277_v28, %v278_v30  ;;  %p602_p7 = pnand %p601_p3, %p595_p5 }
  0x86   : > { %v533_v33 = vpop.eup %532 }
  0x87   : > { %v292_v34 = vmul.f32 1.7320508, %v533_v33 }
  0x89   : > { %v293_v35 = vmul.f32 %v292_v34, %v269_v31  ;;  %v295_v36 = vmul.f32 %v292_v34, %v279_v32 }
  0x8b   : > { %294 = vst [vmem:[%s230_s27] sm:$0x3] %v293_v35  ;;  %436 = vst [vmem:[%s230_s27 + $0x2] sm:$0x3] %v295_v36 }
  0x8c   : > { %605 = shalt.err (!%p602_p7)
}
  0x8d   : > { %s606_s22 = scalar_lea.hbm %s905_s20, 96  ;;  %s610_s4 = scalar_lea.hbm %s957_s3, 192 }
  0x8e   : > { %p607_p9 = scmp.ne.s32.totalorder %s905_s20, %s606_s22  ;;  %p611_p1 = scmp.lt.u32.totalorder %s905_s20, %s957_s3 }
  0x8f   : > { %p612_p8 = scmp.lt.u32.totalorder %s610_s4, %s606_s22  ;;  %p614_p4 = scmp.lt.u32.totalorder %s606_s22, %s905_s20 }
  0x90   : > { %p608_p2 = pnand %p607_p9, %p979_p12 }
  0x91   : > { %p613_p13 = por %p612_p8, %p611_p1 }
  0x92   : > { %p609_p6 = pneg %p608_p2 }
  0x93   : > { %p615_p0 = por %p614_p4, %p613_p13 }
  0x95   : > { %p616_p5 = pnand %p615_p0, %p609_p6 }
  0x97   : > { %619 = shalt.err (!%p616_p5)
}
  0x98   : > { %s690_s2 = smov 32   ;;  %s691_s18 = smov 2  }
  0x99   : > { %455 = dma.vmem_to_hbm [thread:$0]  (%p979_p12), %s900_s1, 96, %s905_s20, %s301_s30, %s690_s2, %s690_s2, %s691_s18  }
  0x9a PF: > { %s330_s21 = sand.u32 1, %s662_s12   ;;  %p980_p10 = scmp.ne.s32.totalorder %s969_s24, 0 }
  0x9b   : > { %p981_p11 = scmp.ge.s32.totalorder %s682_s17, 2  ;;  %s331_s27 = scalar_lea.sflag [#allocation4], %s330_s21 }
  0x9d   : > { %p469_p3 = pnand %p981_p11, %p980_p10 }
  0x9f   : > { %657 = dma.done.wait (!%p469_p3), %s331_s27, 96  }
  0xa0   : > { %659 = vsyncadd (!%p469_p3), %s331_s27, 4294967200  ;;  %s21_s17 = sadd.s32 1, %s682_s17   ;;  %s982_s12 = smov %s666_s13 }
  0xa1   : > { %p18_p7 = scmp.ge.s32.totalorder %s21_s17, 4   ;;  %s983_s13 = smov %s670_s14 }
  0xa2   : > { %s984_s14 = smov %s828_s28  ;;  %s985_s15 = smov %s678_s16 }
  0xa3   : > { %s986_s16 = smov %s988_s5  ;;  %20 = sbr.rel (!%p18_p7) target bundleno = 12 (0xc), region = 91 }
  0xaa   :  { %336 = vsyncpa [#allocation3], 1 }
  0xab   :  { %338 = vsyncpa [#allocation3 + $0x1], 1 }
  0xac   :  { %339 = vsyncpa [#allocation4], 1 }
  0xad   :  { %341 = vsyncpa [#allocation4 + $0x1], 1 }
  0xae   :  { %342 = vsyncpa [#allocation5], 1 }
  0xaf   :  { %344 = vsyncpa [#allocation5 + $0x1], 1 }
  0xb0   :  { %345 = vsyncpa [#allocation6], 1 }
  0xb1   :  { %347 = vsyncpa [#allocation6 + $0x1], 1 }

</bundles_post_ra>
